<compile_context>
chip_gen: v7x
topology: tpu7x:2x2x1
jax: 0.10.0
libtpu: 0.0.40
codegen_flags: <defaults>
</compile_context>

<pallas_src>
import functools

import jax
import jax.numpy as jnp
from jax.experimental import pallas as pl
from jax.experimental.pallas import tpu as pltpu


def _codebook_kernel(e_hsq_ref, e_ref, et_ref, z_ref, zq_ref, idx_ref, sse_ref):
    zt = z_ref[0].astype(jnp.float32)                 # (D, t)  lanes = spatial
    e = e_ref[...].astype(jnp.float32)                # (K, D)  codebook
    et = et_ref[...].astype(jnp.float32)              # (D, K)  codebook, transposed
    e_hsq = e_hsq_ref[...]                            # (K, 1)  0.5*||e_k||^2 (hoisted)

    # <e_k, z_s> for every codeword / spatial position: (K, D) @ (D, t) -> (K, t)
    dots = jax.lax.dot_general(
        e, zt, (((1,), (0,)), ((), ())), preferred_element_type=jnp.float32)

    # argmin_k ||z - e_k||^2 == argmin_k (0.5*||e_k||^2 - <e_k, z>); the per-column
    # ||z||^2 term is constant over k so it is dropped from the argmin path.
    d = e_hsq - dots                                  # (K, t)

    min_d = jnp.min(d, axis=0, keepdims=True)         # (1, t)
    K = d.shape[0]
    row = jax.lax.broadcasted_iota(jnp.int32, d.shape, 0)                 # (K, t)
    idx = jnp.min(jnp.where(d == min_d, row, K), axis=0, keepdims=True)   # (1, t)

    # Gather codebook vectors via one-hot matmul: (D, K) @ (K, t) -> (D, t)
    onehot = (row == idx).astype(jnp.float32)
    zq = jax.lax.dot_general(
        et, onehot, (((1,), (0,)), ((), ())), preferred_element_type=jnp.float32)

    diff = zq - zt
    zq_ref[0] = zq.astype(zq_ref.dtype)
    idx_ref[0] = idx                                  # int32 (torch.argmin is int64)
    sse_ref[0] = jnp.sum(diff * diff, axis=0, keepdims=True)   # per-column SSE


def _pick_spatial_tile(hw, K, *, cap=1024, dist_budget_bytes=4 << 20):
    """Lane tile along H*W.

    Chooses a multiple of 128 that minimizes the padded extent (ties broken
    toward the larger tile), with the tile additionally capped so the (K, t)
    f32 distance intermediates stay within a VMEM budget for large codebooks.
    """
    k_cap = (dist_budget_bytes // (4 * max(K, 1))) // 128 * 128
    cap = max(128, min(cap, k_cap))
    cands = [m * 128 for m in range(1, cap // 128 + 1)]
    t = min(cands, key=lambda c: (pl.cdiv(hw, c) * c, -c))
    return t, pl.cdiv(hw, t) * t


def _quantize(z3, embedding):
    """z3: (N, D, HW) latents in native NCHW memory order."""
    N, D, HW = z3.shape
    K, _ = embedding.shape

    t, hw_pad = _pick_spatial_tile(HW, K)
    if hw_pad != HW:
        z3 = jnp.pad(z3, ((0, 0), (0, 0), (0, hw_pad - HW)))

    # Hoisted constants: halved codebook norms and the transposed codebook
    # (both tiny; computed once outside the grid loop).
    e_hsq = 0.5 * jnp.sum(embedding.astype(jnp.float32) ** 2, axis=1, keepdims=True)
    e_t = jnp.swapaxes(embedding, 0, 1)               # (D, K)

    grid = (N, hw_pad // t)                           # >= 2 steps for N >= 2 (v7x 2-TC)
    zq3, idx3, sse3 = pl.pallas_call(
        _codebook_kernel,
        out_shape=(
            jax.ShapeDtypeStruct((N, D, hw_pad), z3.dtype),
            jax.ShapeDtypeStruct((N, 1, hw_pad), jnp.int32),
            jax.ShapeDtypeStruct((N, 1, hw_pad), jnp.float32),
        ),
        grid_spec=pltpu.PrefetchScalarGridSpec(
            num_scalar_prefetch=0,
            grid=grid,
            in_specs=[
                pl.BlockSpec((K, 1), lambda n, j: (0, 0)),        # 0.5*||e||^2, resident
                pl.BlockSpec((K, D), lambda n, j: (0, 0)),        # codebook, resident
                pl.BlockSpec((D, K), lambda n, j: (0, 0)),        # codebook^T, resident
                pl.BlockSpec((1, D, t), lambda n, j: (n, 0, j)),  # z tile (lanes = HW)
            ],
            out_specs=[
                pl.BlockSpec((1, D, t), lambda n, j: (n, 0, j)),  # z_q, lane-dense
                pl.BlockSpec((1, 1, t), lambda n, j: (n, 0, j)),  # idx, lane-dense
                pl.BlockSpec((1, 1, t), lambda n, j: (n, 0, j)),  # sse, lane-dense
            ],
        ),
        compiler_params=pltpu.CompilerParams(
            dimension_semantics=("parallel", "parallel"),
        ),
    )(e_hsq, embedding, e_t, z3)
    return zq3, idx3, sse3


@functools.partial(jax.jit, static_argnames=("beta",))
def codebook_forward(z, embedding, beta):
    """Forward pass of the VQ Codebook module.

    Args:
      z: (N, C, H, W) float32 latents (C == latent_dim), NCHW like PyTorch.
      embedding: (num_codebook_vectors, latent_dim) float32 codebook.
      beta: commitment cost scalar.
    Returns:
      z_q: (N, C, H, W) quantized latents (straight-through forward value == z_q)
      min_encoding_indices: (N*H*W,) int32 nearest-codebook indices (NHWC order)
      loss: scalar codebook + commitment loss
    """
    N, C, H, W = z.shape
    K, D = embedding.shape
    assert C == D
    HW = H * W

    z3 = z.reshape(N, C, HW)                     # free view, NCHW layout kept
    zq3, idx3, sse3 = _quantize(z3, embedding)

    zq = zq3[:, :, :HW].reshape(N, C, H, W)      # slice away lane padding (no-op if none)
    idx = idx3[:, 0, :HW].reshape(-1)            # row order == NHWC flatten, like PyTorch
    sse = sse3[:, 0, :HW]

    mse = jnp.sum(sse) / (N * HW * D)            # mean((z_q - z)**2)
    # loss = mean((z_q.detach()-z)^2) + beta*mean((z_q - z.detach())^2); both terms
    # equal mse in the forward pass (detach only changes gradients).
    loss = mse + beta * mse
    # TODO(synk): training use needs a custom_vjp implementing the straight-through
    # estimator and the .detach() gradient semantics of the PyTorch loss.
    return zq, idx, loss


def _ref_forward(z, embedding, beta):
    """Pure-JAX reference matching the PyTorch forward."""
    N, C, H, W = z.shape
    z_nhwc = jnp.transpose(z, (0, 2, 3, 1))
    z_flat = z_nhwc.reshape(-1, C)
    d = (jnp.sum(z_flat ** 2, axis=1, keepdims=True)
         + jnp.sum(embedding ** 2, axis=1)
         - 2.0 * z_flat @ embedding.T)
    idx = jnp.argmin(d, axis=1)
    z_q_flat = embedding[idx]
    mse = jnp.mean((z_q_flat - z_flat) ** 2)
    loss = mse + beta * mse
    z_q = jnp.transpose(z_q_flat.reshape(N, H, W, C), (0, 3, 1, 2))
    return z_q, idx, loss


if __name__ == "__main__":
    # Module hyperparameters (args)
    num_codebook_vectors = 256
    latent_dim = 32
    beta = 0.25

    key = jax.random.PRNGKey(0)
    k_z, k_e = jax.random.split(key)

    # Deterministic parameter init, matching uniform_(-1/K, 1/K)
    embedding = jax.random.uniform(
        k_e, (num_codebook_vectors, latent_dim), dtype=jnp.float32,
        minval=-1.0 / num_codebook_vectors, maxval=1.0 / num_codebook_vectors)

    # Two small shapes: one exercising lane padding (HW=64 -> 128) and one
    # with a lane-exact spatial extent (HW=256).
    for (N, H, W) in [(2, 8, 8), (2, 16, 16)]:
        C = latent_dim
        z = jax.random.normal(k_z, (N, C, H, W), dtype=jnp.float32)

        z_q, idx, loss = codebook_forward(z, embedding, beta)
        jax.block_until_ready((z_q, idx, loss))

        # Sanity check against pure-JAX reference
        z_q_ref, idx_ref, loss_ref = _ref_forward(z, embedding, beta)
        assert z_q.shape == (N, C, H, W)
        assert idx.shape == (N * H * W,)
        assert jnp.all(idx == idx_ref.astype(jnp.int32))
        assert jnp.allclose(z_q, z_q_ref, atol=1e-5)
        assert jnp.allclose(loss, loss_ref, atol=1e-6)

    print("KERNEL_OK")
</pallas_src>

<mosaic_0001>
module attributes {stable_mosaic.version = 11 : i64} {
  func.func @_codebook_kernel(%arg0: i32, %arg1: i32, %arg2: memref<256x1xf32, #tpu.memory_space<vmem>>, %arg3: memref<256x32xf32, #tpu.memory_space<vmem>>, %arg4: memref<32x256xf32, #tpu.memory_space<vmem>>, %arg5: memref<1x32x128xf32, #tpu.memory_space<vmem>>, %arg6: memref<1x32x128xf32, #tpu.memory_space<vmem>>, %arg7: memref<1x1x128xi32, #tpu.memory_space<vmem>>, %arg8: memref<1x1x128xf32, #tpu.memory_space<vmem>>) attributes {dimension_semantics = [#tpu.dimension_semantics<parallel>, #tpu.dimension_semantics<parallel>], iteration_bounds = array<i64: 2, 1>, scalar_prefetch = 0 : i64, scratch_operands = 0 : i64, tpu.core_type = #tpu.core_type<tc>, window_params = [{pipeline_mode = #tpu.pipeline_mode<synchronous>, transform_indices = @transform_0, window_bounds = array<i64: 256, 1>}, {pipeline_mode = #tpu.pipeline_mode<synchronous>, transform_indices = @transform_1, window_bounds = array<i64: 256, 32>}, {pipeline_mode = #tpu.pipeline_mode<synchronous>, transform_indices = @transform_2, window_bounds = array<i64: 32, 256>}, {transform_indices = @transform_3, window_bounds = array<i64: 1, 32, 128>}, {transform_indices = @transform_4, window_bounds = array<i64: 1, 32, 128>}, {transform_indices = @transform_5, window_bounds = array<i64: 1, 1, 128>}, {transform_indices = @transform_6, window_bounds = array<i64: 1, 1, 128>}]} {
    %c0 = arith.constant 0 : index
    %c0_0 = arith.constant 0 : index
    %c0_1 = arith.constant 0 : index
    %0 = vector.load %arg5[%c0, %c0_0, %c0_1] : memref<1x32x128xf32, #tpu.memory_space<vmem>>, vector<1x32x128xf32>
    %1 = vector.shape_cast %0 : vector<1x32x128xf32> to vector<32x128xf32>
    %c0_2 = arith.constant 0 : index
    %c0_3 = arith.constant 0 : index
    %2 = vector.load %arg3[%c0_2, %c0_3] : memref<256x32xf32, #tpu.memory_space<vmem>>, vector<256x32xf32>
    %c0_4 = arith.constant 0 : index
    %c0_5 = arith.constant 0 : index
    %3 = vector.load %arg4[%c0_4, %c0_5] : memref<32x256xf32, #tpu.memory_space<vmem>>, vector<32x256xf32>
    %c0_6 = arith.constant 0 : index
    %c0_7 = arith.constant 0 : index
    %4 = vector.load %arg2[%c0_6, %c0_7] : memref<256x1xf32, #tpu.memory_space<vmem>>, vector<256x1xf32>
    %cst = arith.constant dense<0.000000e+00> : vector<256x128xf32>
    %5 = tpu.matmul %2, %1, %cst {dimension_numbers = #tpu.dot_dimension_numbers<[1], [0], [0], [1], [0, 0, 1, 1], [], []>} : vector<256x32xf32>, vector<32x128xf32>, vector<256x128xf32> -> vector<256x128xf32>
    %6 = vector.broadcast %4 : vector<256x1xf32> to vector<256x128xf32>
    %7 = arith.subf %6, %5 : vector<256x128xf32>
    %cst_8 = arith.constant dense<0x7F800000> : vector<128xf32>
    %8 = vector.multi_reduction <minimumf>, %7, %cst_8 [0] : vector<256x128xf32> to vector<128xf32>
    %9 = vector.shape_cast %8 : vector<128xf32> to vector<1x128xf32>
    %10 = tpu.iota {dimensions = array<i32: 0>} : vector<256x128xi32>
    %11 = vector.broadcast %9 : vector<1x128xf32> to vector<256x128xf32>
    %12 = arith.cmpf oeq, %7, %11 : vector<256x128xf32>
    %c256_i32 = arith.constant 256 : i32
    %13 = vector.broadcast %c256_i32 : i32 to vector<256x128xi32>
    %14 = arith.select %12, %10, %13 : vector<256x128xi1>, vector<256x128xi32>
    %cst_9 = arith.constant dense<2147483647> : vector<128xi32>
    %15 = vector.multi_reduction <minsi>, %14, %cst_9 [0] : vector<256x128xi32> to vector<128xi32>
    %16 = vector.shape_cast %15 : vector<128xi32> to vector<1x128xi32>
    %17 = vector.broadcast %16 : vector<1x128xi32> to vector<256x128xi32>
    %18 = arith.cmpi eq, %10, %17 : vector<256x128xi32>
    %19 = arith.extui %18 : vector<256x128xi1> to vector<256x128xi32>
    %20 = arith.sitofp %19 : vector<256x128xi32> to vector<256x128xf32>
    %cst_10 = arith.constant dense<0.000000e+00> : vector<32x128xf32>
    %21 = tpu.matmul %3, %20, %cst_10 {dimension_numbers = #tpu.dot_dimension_numbers<[1], [0], [0], [1], [0, 0, 1, 1], [], []>} : vector<32x256xf32>, vector<256x128xf32>, vector<32x128xf32> -> vector<32x128xf32>
    %22 = arith.subf %21, %1 : vector<32x128xf32>
    %c0_11 = arith.constant 0 : index
    %c0_12 = arith.constant 0 : index
    %c0_13 = arith.constant 0 : index
    %23 = vector.load %arg6[%c0_11, %c0_12, %c0_13] : memref<1x32x128xf32, #tpu.memory_space<vmem>>, vector<1x32x128xf32>
    %24 = vector.shape_cast %23 : vector<1x32x128xf32> to vector<32x128xf32>
    %25 = vector.shape_cast %21 : vector<32x128xf32> to vector<1x32x128xf32>
    tpu.vector_store %arg6[%c0_11, %c0_12, %c0_13], %25 {strides = array<i32>} : memref<1x32x128xf32, #tpu.memory_space<vmem>>, vector<1x32x128xf32>,
    %c0_14 = arith.constant 0 : index
    %c0_15 = arith.constant 0 : index
    %c0_16 = arith.constant 0 : index
    %26 = vector.load %arg7[%c0_14, %c0_15, %c0_16] : memref<1x1x128xi32, #tpu.memory_space<vmem>>, vector<1x1x128xi32>
    %27 = vector.shape_cast %26 : vector<1x1x128xi32> to vector<1x128xi32>
    %28 = vector.shape_cast %16 : vector<1x128xi32> to vector<1x1x128xi32>
    tpu.vector_store %arg7[%c0_14, %c0_15, %c0_16], %28 {strides = array<i32>} : memref<1x1x128xi32, #tpu.memory_space<vmem>>, vector<1x1x128xi32>,
    %29 = arith.mulf %22, %22 : vector<32x128xf32>
    %cst_17 = arith.constant dense<0.000000e+00> : vector<128xf32>
    %30 = vector.multi_reduction <add>, %29, %cst_17 [0] : vector<32x128xf32> to vector<128xf32>
    %31 = vector.shape_cast %30 : vector<128xf32> to vector<1x128xf32>
    %c0_18 = arith.constant 0 : index
    %c0_19 = arith.constant 0 : index
    %c0_20 = arith.constant 0 : index
    %32 = vector.load %arg8[%c0_18, %c0_19, %c0_20] : memref<1x1x128xf32, #tpu.memory_space<vmem>>, vector<1x1x128xf32>
    %33 = vector.shape_cast %32 : vector<1x1x128xf32> to vector<1x128xf32>
    %34 = vector.shape_cast %31 : vector<1x128xf32> to vector<1x1x128xf32>
    tpu.vector_store %arg8[%c0_18, %c0_19, %c0_20], %34 {strides = array<i32>} : memref<1x1x128xf32, #tpu.memory_space<vmem>>, vector<1x1x128xf32>,
    return
  }
  func.func @transform_0(%arg0: i32, %arg1: i32) -> (i32, i32) {
    %c0_i32 = arith.constant 0 : i32
    %c0_i32_0 = arith.constant 0 : i32
    %c0_i32_1 = arith.constant 0 : i32
    return %c0_i32, %c0_i32_0 : i32, i32
  }
  func.func @transform_1(%arg0: i32, %arg1: i32) -> (i32, i32) {
    %c0_i32 = arith.constant 0 : i32
    %c0_i32_0 = arith.constant 0 : i32
    %c0_i32_1 = arith.constant 0 : i32
    return %c0_i32, %c0_i32_0 : i32, i32
  }
  func.func @transform_2(%arg0: i32, %arg1: i32) -> (i32, i32) {
    %c0_i32 = arith.constant 0 : i32
    %c0_i32_0 = arith.constant 0 : i32
    %c0_i32_1 = arith.constant 0 : i32
    return %c0_i32, %c0_i32_0 : i32, i32
  }
  func.func @transform_3(%arg0: i32, %arg1: i32) -> (i32, i32, i32) {
    %c0_i32 = arith.constant 0 : i32
    %c0_i32_0 = arith.constant 0 : i32
    return %arg0, %c0_i32, %arg1 : i32, i32, i32
  }
  func.func @transform_4(%arg0: i32, %arg1: i32) -> (i32, i32, i32) {
    %c0_i32 = arith.constant 0 : i32
    %c0_i32_0 = arith.constant 0 : i32
    return %arg0, %c0_i32, %arg1 : i32, i32, i32
  }
  func.func @transform_5(%arg0: i32, %arg1: i32) -> (i32, i32, i32) {
    %c0_i32 = arith.constant 0 : i32
    %c0_i32_0 = arith.constant 0 : i32
    return %arg0, %c0_i32, %arg1 : i32, i32, i32
  }
  func.func @transform_6(%arg0: i32, %arg1: i32) -> (i32, i32, i32) {
    %c0_i32 = arith.constant 0 : i32
    %c0_i32_0 = arith.constant 0 : i32
    return %arg0, %c0_i32, %arg1 : i32, i32, i32
  }
}

</mosaic_0001>

<bundles_post_ra>
// kernel: squeeze.2
= control target key start
LH: loop header
LB: loop body
LE: loop exit
PB: predicated region body
PF: predicated region fallthrough
CT: control target
= control target key end

     0   :  { %s85_s0 = inlined_call_operand.vmem [shape: s32[2,64], index: 0, kind: input, shape index: {}]   ;;  %s86_s1 = inlined_call_operand.hbm [shape: s32[128], index: 1, kind: output, shape index: {}]  }
   0x1   :  { %v5_v0 = vld [vmem:[%s85_s0] sm:$0x3] }
   0x2   :  { %6 = vst [vmem:[#allocation3] sm:$0x3] %v5_v0 }
   0x3   :  { %2 = vsyncpa [#allocation1], 0  ;;  %vm8_vm0 = vcmask 523264   ;;  %s58_s0 = smov 64   ;;  %vm14_vm1 = vcmask 1048064   ;;  %s59_s8 = smov [#allocation0]  }
   0x4   :  { %s26_s9 = sshll.u32 %s59_s8, 4  ;;  %s27_s9 = int_to_ptr.vmem [resolvable:$true] %s26_s9 }
   0x5   :  { %s34_s10 = scalar_lea.vmem %s27_s9, 16  ;;  %s38_s11 = scalar_lea.vmem %s27_s9, 32 }
   0x6   :  { %p35_p0 = scmp.ne.s32.totalorder %s27_s9, %s34_s10  ;;  %p39_p1 = scmp.lt.s32.totalorder %s27_s9, %s27_s9 }
   0x7   :  { %p40_p2 = scmp.lt.s32.totalorder %s38_s11, %s34_s10 }
   0x9   :  { %v11_v1 = vld [vmem:[#allocation3 + $0x1] sm:$0x1]   ;;  %v7_v2 = vld [vmem:[#allocation3] sm:$0x1]   ;;  %p41_p3 = por %p40_p2, %p39_p1 }
   0xa   :  { %12 = vrot.lane.b32.xlu0 %v11_v1, %s58_s0  ;;  %9 = vst.msk [vmem:[#allocation2] sm:$0x1] %vm8_vm0, %v7_v2  }
   0xb   :  { %p42_p4 = pnand %p41_p3, %p35_p0 }
  0x7c   :  { %v13_v3 = vpop.permute.xlu0 %12  }
  0x7d   :  { %15 = vst.msk [vmem:[#allocation2] sm:$0x1] %vm14_vm1, %v13_v3  }
  0x84   :  { %v19_v4 = vld [vmem:[#allocation2] sm:$0x1] }
  0x85   :  { %21 = vst [vmem:[#allocation0] sm:$0x1] %v19_v4 }
  0x86   :  { %45 = shalt.err (!%p42_p4)
}
  0x87   :  { %s46_s14 = scalar_lea.hbm %s86_s1, 16 }
  0x88   :  { %p47_p5 = scmp.ne.s32.totalorder %s86_s1, %s46_s14  ;;  %p50_p6 = scmp.lt.u32.totalorder %s46_s14, %s86_s1 }
  0x8a   :  { %p52_p7 = pnand %p50_p6, %p47_p5 }
  0x8c   :  { %55 = shalt.err (!%p52_p7)
}
  0x8d   :  { %29 = dma.vmem_to_hbm [thread:$0]  %s27_s9, 16, %s86_s1, [#allocation1]  }
  0x8e   :  { %56 = dma.done.wait [#allocation1], 16  }
  0x8f   :  { %57 = vsyncadd [#allocation1], 4294967280 }
  0x90   :  { %31 = vsyncpa [#allocation1], 1 }

// kernel: codebook_forward.1
= control target key start
LH: loop header
LB: loop body
LE: loop exit
PB: predicated region body
PF: predicated region fallthrough
CT: control target
= control target key end

     0   :  { %s1846_s21 = smov 0   ;;  %s1848_s22 = smov 0   ;;  %s2604_s0 = inlined_call_operand.vmem [shape: f32[256,1], index: 0, kind: input, shape index: {}]   ;;  %s2605_s1 = inlined_call_operand.vmem [shape: f32[256,32], index: 1, kind: input, shape index: {}]   ;;  %s2606_s2 = inlined_call_operand.vmem [shape: f32[32,256], index: 2, kind: input, shape index: {}]   ;;  %s2607_s3 = inlined_call_operand.vmem [shape: f32[2,32,128], index: 3, kind: input, shape index: {}]   ;;  %s2608_s4 = inlined_call_operand.vmem [shape: f32[2,32,128], index: 4, kind: output, shape index: {0}]   ;;  %s2609_s5 = inlined_call_operand.vmem [shape: s32[2,1,128], index: 5, kind: output, shape index: {1}]   ;;  %s2610_s6 = inlined_call_operand.vmem [shape: f32[2,1,128], index: 6, kind: output, shape index: {2}]  }
   0x1   :  { %s1850_s23 = smov 0  }
   0x2 LB: > { %s29_s24 = sadd.s32 1, %s1803_s22  ;;  %p1472_p0 = scmp.ge.s32.totalorder %s1807_s23, 1  ;;  %s1807_s23 = sphi %s1850_s23, %s17_s23   ;;  %s1803_s22 = sphi %s1848_s22, %s2677_s22   ;;  %s1799_s21 = sphi %s1846_s21, %s2676_s21  }
   0x3   : > { %p31_p1 = scmp.ge.s32.totalorder %s29_s24, 2  ;;  %p240_p2 = scmp.lt.s32.totalorder %s1807_s23, 3 }
   0x5   : > { %s2679_s24 = smov (%p31_p1, %s29_s24), 0  ;;  %p241_p3 = pnand %p1472_p0, %p240_p2 }
   0x7   : > { %244 = sbr.rel (%p241_p3) target bundleno = 649 (0x289), region = 36 }
   0xe   : > { %p288_p4 = scmp.lt.s32.totalorder %s1799_s21, 1  ;;  %v320_v0 = vld [vmem:[%s2605_s1] sm:$0xff]  ;;  %vm392_vm0 = vcmask 261120   ;;  %v1809_v1 = vmov 0   ;;  %v362_v2 = vld [vmem:[%s2604_s0 + $0x10] sm:$0xff]  ;;  %v363_v9 = vld [vmem:[%s2604_s0 + $0x18] sm:$0xff] }
   0xf   : > { %1665 = vmatprep.mubr.msk.f32.mxu0 %vm392_vm0, %v320_v0  ;;  %1780 = vset.pattern.permute.xlu1 %v1809_v1  ;;  %v360_v3 = vld [vmem:[%s2604_s0] sm:$0xff]  ;;  %v361_v10 = vld [vmem:[%s2604_s0 + $0x8] sm:$0xff]  ;;  %v367_v15 = vld [vmem:[%s2604_s0 + $0x38] sm:$0xff] }
  0x10   : > { %s2681_s21 = smov (!%p288_p4, %s1799_s21), 1  ;;  %1779 = vset.pattern.permute.xlu0 %v1809_v1  ;;  %726 = vperm.xlu1 %1780, %v362_v2   ;;  %v365_v12 = vld [vmem:[%s2604_s0 + $0x28] sm:$0xff]  ;;  %v364_v13 = vld [vmem:[%s2604_s0 + $0x20] sm:$0xff]  ;;  %v322_v16 = vld [vmem:[%s2605_s1 + $0x10] sm:$0xff] }
  0x11   : > { %s1575_s27 = sshll.u32 %s2681_s21, 5  ;;  %716 = vperm.xlu0 %1779, %v360_v3   ;;  %v321_v14 = vld [vmem:[%s2605_s1 + $0x8] sm:$0xff]  ;;  %v366_v17 = vld [vmem:[%s2604_s0 + $0x30] sm:$0xff]  ;;  %v323_v18 = vld [vmem:[%s2605_s1 + $0x18] sm:$0xff]  ;;  %s309_s11 = scalar_lea.vmem %s2609_s5, %s2681_s21 }
  0x12   : > { %s1879_s8 = scalar_lea.vmem %s2607_s3, %s1575_s27  ;;  %v369_v19 = vld [vmem:[%s2604_s0 + $0x48] sm:$0xff]  ;;  %v324_v20 = vld [vmem:[%s2605_s1 + $0x20] sm:$0xff]  ;;  %v371_v23 = vld [vmem:[%s2604_s0 + $0x58] sm:$0xff]  ;;  %s303_s10 = scalar_lea.vmem %s2608_s4, %s1575_s27 }
  0x13   : > { %v316_v4 = vld [vmem:[%s1879_s8] sm:$0xff]  ;;  %v317_v5 = vld [vmem:[%s1879_s8 + $0x8] sm:$0xff]  ;;  %v318_v6 = vld [vmem:[%s1879_s8 + $0x10] sm:$0xff]  ;;  %s315_s12 = scalar_lea.vmem %s2610_s6, %s2681_s21 }
  0x14   : > { %v1713_v7 = vpack.c.bf16 %v317_v5, %v316_v4  ;;  %v319_v8 = vld [vmem:[%s1879_s8 + $0x18] sm:$0xff]  ;;  %731 = vperm.xlu1 %1780, %v363_v9   ;;  %v368_v21 = vld [vmem:[%s2604_s0 + $0x40] sm:$0xff]  ;;  %v325_v22 = vld [vmem:[%s2605_s1 + $0x28] sm:$0xff] }
  0x15   : > { %v1717_v11 = vpack.c.bf16 %v319_v8, %v318_v6  ;;  %721 = vperm.xlu0 %1779, %v361_v10   ;;  %v326_v24 = vld [vmem:[%s2605_s1 + $0x30] sm:$0xff]  ;;  %v327_v26 = vld [vmem:[%s2605_s1 + $0x38] sm:$0xff]  ;;  %v373_v27 = vld [vmem:[%s2604_s0 + $0x68] sm:$0xff] }
  0x16   : > { %1714 = vmatprep.subr.bf16.mxu0 %v1713_v7  ;;  %v370_v25 = vld [vmem:[%s2604_s0 + $0x50] sm:$0xff]  ;;  %v328_v28 = vld [vmem:[%s2605_s1 + $0x40] sm:$0xff]  ;;  %v329_v30 = vld [vmem:[%s2605_s1 + $0x48] sm:$0xff] }
  0x17   : > { %1716 = vmatpush3.bf16.msra.mxu0 %v1713_v7  ;;  %v372_v29 = vld [vmem:[%s2604_s0 + $0x60] sm:$0xff]  ;;  %v375_v31 = vld [vmem:[%s2604_s0 + $0x78] sm:$0xff]  ;;  %v330_v32 = vld [vmem:[%s2605_s1 + $0x50] sm:$0xff] }
  0x18   : > { %1718 = vmatprep.subr.bf16.mxu0 %v1717_v11  ;;  %741 = vperm.xlu1 %1780, %v365_v12   ;;  %v374_v33 = vld [vmem:[%s2604_s0 + $0x70] sm:$0xff]  ;;  %v331_v34 = vld [vmem:[%s2605_s1 + $0x58] sm:$0xff]  ;;  %v377_v35 = vld [vmem:[%s2604_s0 + $0x88] sm:$0xff] }
  0x19   : > { %736 = vperm.xlu0 %1779, %v364_v13   ;;  %v332_v36 = vld [vmem:[%s2605_s1 + $0x60] sm:$0xff]  ;;  %v333_v38 = vld [vmem:[%s2605_s1 + $0x68] sm:$0xff]  ;;  %v379_v39 = vld [vmem:[%s2604_s0 + $0x98] sm:$0xff] }
  0x1a   : > { %v376_v37 = vld [vmem:[%s2604_s0 + $0x80] sm:$0xff]  ;;  %v334_v40 = vld [vmem:[%s2605_s1 + $0x70] sm:$0xff]  ;;  %v335_v42 = vld [vmem:[%s2605_s1 + $0x78] sm:$0xff] }
  0x1b   : > { %1720 = vmatpush3.bf16.msra.mxu0 %v1717_v11  ;;  %v378_v41 = vld [vmem:[%s2604_s0 + $0x90] sm:$0xff]  ;;  %v381_v43 = vld [vmem:[%s2604_s0 + $0xa8] sm:$0xff]  ;;  %v336_v44 = vld [vmem:[%s2605_s1 + $0x80] sm:$0xff] }
  0x1c   : > { %751 = vperm.xlu1 %1780, %v367_v15   ;;  %v380_v45 = vld [vmem:[%s2604_s0 + $0xa0] sm:$0xff]  ;;  %v337_v46 = vld [vmem:[%s2605_s1 + $0x88] sm:$0xff]  ;;  %v383_v47 = vld [vmem:[%s2604_s0 + $0xb8] sm:$0xff] }
  0x1d   : > { %746 = vperm.xlu0 %1779, %v366_v17   ;;  %v338_v48 = vld [vmem:[%s2605_s1 + $0x90] sm:$0xff]  ;;  %v339_v50 = vld [vmem:[%s2605_s1 + $0x98] sm:$0xff]  ;;  %v385_v51 = vld [vmem:[%s2604_s0 + $0xc8] sm:$0xff] }
  0x1e   : > { %1666 = vmatmul.mubr.msk.f32.vlgmr.msra.gmra.mrb[0].mxu0 %vm392_vm0, %v321_v14  ;;  %v382_v49 = vld [vmem:[%s2604_s0 + $0xb0] sm:$0xff]  ;;  %v340_v52 = vld [vmem:[%s2605_s1 + $0xa0] sm:$0xff]  ;;  %v341_v54 = vld [vmem:[%s2605_s1 + $0xa8] sm:$0xff] }
  0x1f   : > { %1668 = vmatprep.mubr.msk.f32.mxu0 %vm392_vm0, %v322_v16  ;;  %v384_v53 = vld [vmem:[%s2604_s0 + $0xc0] sm:$0xff]  ;;  %v387_v55 = vld [vmem:[%s2604_s0 + $0xd8] sm:$0xff]  ;;  %v342_v56 = vld [vmem:[%s2605_s1 + $0xb0] sm:$0xff] }
  0x20   : > { %761 = vperm.xlu1 %1780, %v369_v19   ;;  %v386_v57 = vld [vmem:[%s2604_s0 + $0xd0] sm:$0xff]  ;;  %v343_v58 = vld [vmem:[%s2605_s1 + $0xb8] sm:$0xff]  ;;  %v389_v59 = vld [vmem:[%s2604_s0 + $0xe8] sm:$0xff] }
  0x21   : > { %756 = vperm.xlu0 %1779, %v368_v21   ;;  %v344_v60 = vld [vmem:[%s2605_s1 + $0xc0] sm:$0xff]  ;;  %v345_v62 = vld [vmem:[%s2605_s1 + $0xc8] sm:$0xff]  ;;  %v391_v63 = vld [vmem:[%s2604_s0 + $0xf8] sm:$0xff] }
  0x22   : > { %1669 = vmatmul.mubr.msk.f32.gmra.mrb[2].mxu0 %vm392_vm0, %v323_v18  ;;  %v388_v61 = vld [vmem:[%s2604_s0 + $0xe0] sm:$0xff]  ;;  %v346_v0 = vld [vmem:[%s2605_s1 + $0xd0] sm:$0xff]  ;;  %v347_v2 = vld [vmem:[%s2605_s1 + $0xd8] sm:$0xff] }
  0x23   : > { %1671 = vmatprep.mubr.msk.f32.mxu0 %vm392_vm0, %v324_v20  ;;  %v390_v1 = vld [vmem:[%s2604_s0 + $0xf0] sm:$0xff]  ;;  %v348_v3 = vld [vmem:[%s2605_s1 + $0xe0] sm:$0xff]  ;;  %v349_v4 = vld [vmem:[%s2605_s1 + $0xe8] sm:$0xff] }
  0x24   : > { %771 = vperm.xlu1 %1780, %v371_v23   ;;  %v350_v5 = vld [vmem:[%s2605_s1 + $0xf0] sm:$0xff]  ;;  %v351_v6 = vld [vmem:[%s2605_s1 + $0xf8] sm:$0xff] }
  0x25   : > { %766 = vperm.xlu0 %1779, %v370_v25  }
  0x26   : > { %1672 = vmatmul.mubr.msk.f32.gmra.mrb[4].mxu0 %vm392_vm0, %v325_v22 }
  0x27   : > { %1674 = vmatprep.mubr.msk.f32.mxu0 %vm392_vm0, %v326_v24 }
  0x28   : > { %781 = vperm.xlu1 %1780, %v373_v27  }
  0x29   : > { %776 = vperm.xlu0 %1779, %v372_v29  }
  0x2a   : > { %1675 = vmatmul.mubr.msk.f32.gmra.mrb[6].mxu0 %vm392_vm0, %v327_v26 }
  0x2b   : > { %1677 = vmatprep.mubr.msk.f32.mxu0 %vm392_vm0, %v328_v28 }
  0x2c   : > { %791 = vperm.xlu1 %1780, %v375_v31  }
  0x2d   : > { %786 = vperm.xlu0 %1779, %v374_v33  }
  0x2e   : > { %1678 = vmatmul.mubr.msk.f32.gmra.mrb[8].mxu0 %vm392_vm0, %v329_v30 }
  0x2f   : > { %1680 = vmatprep.mubr.msk.f32.mxu0 %vm392_vm0, %v330_v32 }
  0x30   : > { %801 = vperm.xlu1 %1780, %v377_v35  }
  0x31   : > { %796 = vperm.xlu0 %1779, %v376_v37  }
  0x32   : > { %1681 = vmatmul.mubr.msk.f32.gmra.mrb[10].mxu0 %vm392_vm0, %v331_v34 }
  0x33   : > { %1683 = vmatprep.mubr.msk.f32.mxu0 %vm392_vm0, %v332_v36 }
  0x34   : > { %811 = vperm.xlu1 %1780, %v379_v39  }
  0x35   : > { %806 = vperm.xlu0 %1779, %v378_v41  }
  0x36   : > { %1684 = vmatmul.mubr.msk.f32.gmra.mrb[12].mxu0 %vm392_vm0, %v333_v38 }
  0x37   : > { %1686 = vmatprep.mubr.msk.f32.mxu0 %vm392_vm0, %v334_v40 }
  0x38   : > { %821 = vperm.xlu1 %1780, %v381_v43  }
  0x39   : > { %816 = vperm.xlu0 %1779, %v380_v45  }
  0x3a   : > { %1687 = vmatmul.mubr.msk.f32.gmra.mrb[14].mxu0 %vm392_vm0, %v335_v42 }
  0x3b   : > { %1689 = vmatprep.mubr.msk.f32.mxu0 %vm392_vm0, %v336_v44 }
  0x3c   : > { %831 = vperm.xlu1 %1780, %v383_v47  }
  0x3d   : > { %826 = vperm.xlu0 %1779, %v382_v49  }
  0x3e   : > { %1690 = vmatmul.mubr.msk.f32.gmra.mrb[16].mxu0 %vm392_vm0, %v337_v46 }
  0x3f   : > { %1692 = vmatprep.mubr.msk.f32.mxu0 %vm392_vm0, %v338_v48 }
  0x40   : > { %841 = vperm.xlu1 %1780, %v385_v51  }
  0x41   : > { %836 = vperm.xlu0 %1779, %v384_v53  }
  0x42   : > { %1693 = vmatmul.mubr.msk.f32.gmra.mrb[18].mxu0 %vm392_vm0, %v339_v50 }
  0x43   : > { %1695 = vmatprep.mubr.msk.f32.mxu0 %vm392_vm0, %v340_v52 }
  0x44   : > { %851 = vperm.xlu1 %1780, %v387_v55  }
  0x45   : > { %846 = vperm.xlu0 %1779, %v386_v57  }
  0x46   : > { %1696 = vmatmul.mubr.msk.f32.gmra.mrb[20].mxu0 %vm392_vm0, %v341_v54 }
  0x47   : > { %1698 = vmatprep.mubr.msk.f32.mxu0 %vm392_vm0, %v342_v56 }
  0x48   : > { %861 = vperm.xlu1 %1780, %v389_v59  }
  0x49   : > { %856 = vperm.xlu0 %1779, %v388_v61  }
  0x4a   : > { %1699 = vmatmul.mubr.msk.f32.gmra.mrb[22].mxu0 %vm392_vm0, %v343_v58 }
  0x4b   : > { %1701 = vmatprep.mubr.msk.f32.mxu0 %vm392_vm0, %v344_v60 }
  0x4c   : > { %871 = vperm.xlu1 %1780, %v391_v63  }
  0x4d   : > { %866 = vperm.xlu0 %1779, %v390_v1  }
  0x4e   : > { %1702 = vmatmul.mubr.msk.f32.gmra.mrb[24].mxu0 %vm392_vm0, %v345_v62 }
  0x4f   : > { %1704 = vmatprep.mubr.msk.f32.mxu0 %vm392_vm0, %v346_v0 }
  0x52   : > { %1705 = vmatmul.mubr.msk.f32.gmra.mrb[26].mxu0 %vm392_vm0, %v347_v2 }
  0x53   : > { %1707 = vmatprep.mubr.msk.f32.mxu0 %vm392_vm0, %v348_v3 }
  0x56   : > { %1708 = vmatmul.mubr.msk.f32.gmra.mrb[28].mxu0 %vm392_vm0, %v349_v4 }
  0x57   : > { %1710 = vmatprep.mubr.msk.f32.mxu0 %vm392_vm0, %v350_v5 }
  0x5a   : > { %1711 = vmatmul.mubr.msk.f32.gmra.mrb[30].mxu0 %vm392_vm0, %v351_v6 }
  0x8f   : > { %v727_v7 = vpop.permute.xlu1 %726 }
  0x90   : > { %v717_v8 = vpop.permute.xlu0 %716 }
  0x93   : > { %v732_v9 = vpop.permute.xlu1 %731 }
  0x94   : > { %v722_v10 = vpop.permute.xlu0 %721 }
  0x97   : > { %v742_v11 = vpop.permute.xlu1 %741 }
  0x98   : > { %v737_v12 = vpop.permute.xlu0 %736 }
  0x9b   : > { %v752_v13 = vpop.permute.xlu1 %751 }
  0x9c   : > { %v747_v14 = vpop.permute.xlu0 %746 }
  0x9f   : > { %v762_v15 = vpop.permute.xlu1 %761 }
  0xa0   : > { %v757_v16 = vpop.permute.xlu0 %756 }
  0xa3   : > { %v772_v17 = vpop.permute.xlu1 %771 }
  0xa4   : > { %v767_v19 = vpop.permute.xlu0 %766 }
  0xa7   : > { %v782_v23 = vpop.permute.xlu1 %781 }
  0xa8   : > { %v777_v24 = vpop.permute.xlu0 %776 }
  0xab   : > { %v792_v32 = vpop.permute.xlu1 %791 }
  0xac   : > { %v787_v35 = vpop.permute.xlu0 %786 }
  0xaf   : > { %v802_v46 = vpop.permute.xlu1 %801 }
  0xb0   : > { %v797_v48 = vpop.permute.xlu0 %796 }
  0xb3   : > { %v812_v56 = vpop.permute.xlu1 %811 }
  0xb4   : > { %v807_v59 = vpop.permute.xlu0 %806 }
  0xb7   : > { %v822_v4 = vpop.permute.xlu1 %821 }
  0xb8   : > { %v817_v6 = vpop.permute.xlu0 %816 }
  0xf1   : > { %v1667_v18 = vpop.f32.mrb[0].mxu0 }
  0xf2   : > { %v555_v20 = vpop.f32.mrb[1].mxu0  ;;  %v2102_v26 = vsub.f32 %v722_v10, %v1667_v18  ;;  %v827_v18 = vpop.permute.xlu0 %826 }
  0xf3   : > { %v2106_v29 = vsub.f32 %v717_v8, %v555_v20  ;;  %v353_v8 = vld [vmem:[%s2606_s2 + $0x8] sm:$0xff] }
  0xf4   : > { %1271 = vmatprep.mubr.f32.mxu1 %v353_v8 }
  0xf5   : > { %v1670_v21 = vpop.f32.mrb[2].mxu0 }
  0xf6   : > { %v565_v22 = vpop.f32.mrb[3].mxu0  ;;  %v2114_v36 = vsub.f32 %v732_v9, %v1670_v21 }
  0xf7   : > { %v2118_v39 = vsub.f32 %v727_v7, %v565_v22 }
  0xf9   : > { %v1673_v25 = vpop.f32.mrb[4].mxu0 }
  0xfa   : > { %v2104_v27 = vsub.f32 %v742_v11, %v1673_v25  ;;  %v575_v28 = vpop.f32.mrb[5].mxu0 }
  0xfb   : > { %v2108_v30 = vsub.f32 %v737_v12, %v575_v28 }
  0xfc   : > { %v907_v31 = vmin.f32 %v2102_v26, %v2104_v27 }
  0xfd   : > { %v906_v33 = vmin.f32 %v2106_v29, %v2108_v30  ;;  %v1676_v34 = vpop.f32.mrb[6].mxu0 }
  0xfe   : > { %v2116_v37 = vsub.f32 %v752_v13, %v1676_v34  ;;  %v585_v38 = vpop.f32.mrb[7].mxu0 }
  0xff   : > { %v2120_v40 = vsub.f32 %v747_v14, %v585_v38 }
 0x100   : > { %v909_v41 = vmin.f32 %v2114_v36, %v2116_v37 }
 0x101   : > { %v908_v42 = vmin.f32 %v2118_v39, %v2120_v40  ;;  %v1679_v43 = vpop.f32.mrb[8].mxu0 }
 0x102   : > { %v2126_v44 = vsub.f32 %v762_v15, %v1679_v43  ;;  %v595_v45 = vpop.f32.mrb[9].mxu0  ;;  %v832_v15 = vpop.permute.xlu1 %831 }
 0x103   : > { %v2128_v47 = vsub.f32 %v757_v16, %v595_v45 }
 0x104   : > { %v911_v49 = vmin.f32 %v907_v31, %v2126_v44 }
 0x105   : > { %v910_v50 = vmin.f32 %v906_v33, %v2128_v47  ;;  %v1682_v51 = vpop.f32.mrb[10].mxu0  ;;  %v837_v33 = vpop.permute.xlu0 %836 }
 0x106   : > { %v2132_v52 = vsub.f32 %v772_v17, %v1682_v51  ;;  %v605_v53 = vpop.f32.mrb[11].mxu0  ;;  %v842_v31 = vpop.permute.xlu1 %841 }
 0x107   : > { %v2134_v54 = vsub.f32 %v767_v19, %v605_v53 }
 0x108   : > { %v913_v55 = vmin.f32 %v909_v41, %v2132_v52 }
 0x109   : > { %v912_v57 = vmin.f32 %v908_v42, %v2134_v54  ;;  %v1685_v58 = vpop.f32.mrb[12].mxu0 }
 0x10a   : > { %v2138_v60 = vsub.f32 %v782_v23, %v1685_v58  ;;  %v615_v61 = vpop.f32.mrb[13].mxu0 }
 0x10b   : > { %v2140_v62 = vsub.f32 %v777_v24, %v615_v61 }
 0x10c   : > { %v915_v63 = vmin.f32 %v911_v49, %v2138_v60 }
 0x10d   : > { %v914_v0 = vmin.f32 %v910_v50, %v2140_v62  ;;  %v1688_v1 = vpop.f32.mrb[14].mxu0  ;;  %v847_v50 = vpop.permute.xlu0 %846 }
 0x10e   : > { %v2144_v2 = vsub.f32 %v792_v32, %v1688_v1  ;;  %v625_v3 = vpop.f32.mrb[15].mxu0 }
 0x10f   : > { %v2146_v5 = vsub.f32 %v787_v35, %v625_v3 }
 0x110   : > { %v917_v7 = vmin.f32 %v913_v55, %v2144_v2 }
 0x111   : > { %v916_v9 = vmin.f32 %v912_v57, %v2146_v5  ;;  %v1691_v10 = vpop.f32.mrb[16].mxu0  ;;  %v857_v1 = vpop.permute.xlu0 %856 }
 0x112   : > { %v2153_v11 = vsub.f32 %v802_v46, %v1691_v10  ;;  %v635_v12 = vpop.f32.mrb[17].mxu0  ;;  %v852_v46 = vpop.permute.xlu1 %851 }
 0x113   : > { %v2155_v13 = vsub.f32 %v797_v48, %v635_v12 }
 0x114   : > { %v919_v14 = vmin.f32 %v915_v63, %v2153_v11 }
 0x115   : > { %v918_v16 = vmin.f32 %v914_v0, %v2155_v13  ;;  %v1694_v17 = vpop.f32.mrb[18].mxu0 }
 0x116   : > { %v2159_v19 = vsub.f32 %v812_v56, %v1694_v17  ;;  %v645_v20 = vpop.f32.mrb[19].mxu0  ;;  %v862_v63 = vpop.permute.xlu1 %861 }
 0x117   : > { %v2161_v21 = vsub.f32 %v807_v59, %v645_v20 }
 0x118   : > { %v921_v22 = vmin.f32 %v917_v7, %v2159_v19 }
 0x119   : > { %v920_v23 = vmin.f32 %v916_v9, %v2161_v21  ;;  %v1697_v24 = vpop.f32.mrb[20].mxu0 }
 0x11a   : > { %v2165_v25 = vsub.f32 %v822_v4, %v1697_v24  ;;  %v655_v28 = vpop.f32.mrb[21].mxu0  ;;  %v872_v12 = vpop.permute.xlu1 %871 }
 0x11b   : > { %v2167_v32 = vsub.f32 %v817_v6, %v655_v28  ;;  %v943_v28 = vlaneseq }
 0x11c   : > { %v923_v34 = vmin.f32 %v919_v14, %v2165_v25 }
 0x11d   : > { %v922_v35 = vmin.f32 %v918_v16, %v2167_v32  ;;  %v1700_v38 = vpop.f32.mrb[22].mxu0  ;;  %v867_v16 = vpop.permute.xlu0 %866 }
 0x11e   : > { %v2171_v41 = vsub.f32 %v832_v15, %v1700_v38  ;;  %v665_v42 = vpop.f32.mrb[23].mxu0 }
 0x11f   : > { %v2173_v43 = vsub.f32 %v827_v18, %v665_v42 }
 0x120   : > { %v925_v45 = vmin.f32 %v921_v22, %v2171_v41 }
 0x121   : > { %v924_v48 = vmin.f32 %v920_v23, %v2173_v43  ;;  %v1703_v49 = vpop.f32.mrb[24].mxu0 }
 0x122   : > { %v2177_v51 = vsub.f32 %v842_v31, %v1703_v49  ;;  %v675_v53 = vpop.f32.mrb[25].mxu0 }
 0x123   : > { %v2179_v55 = vsub.f32 %v837_v33, %v675_v53 }
 0x124   : > { %v927_v56 = vmin.f32 %v923_v34, %v2177_v51  ;;  %v2201_v34 = vshrl.u32 %v943_v28, 7 }
 0x125   : > { %v926_v57 = vmin.f32 %v922_v35, %v2179_v55  ;;  %v1706_v58 = vpop.f32.mrb[26].mxu0 }
 0x126   : > { %v2183_v59 = vsub.f32 %v852_v46, %v1706_v58  ;;  %v685_v61 = vpop.f32.mrb[27].mxu0  ;;  %v2204_v42 = vadd.s32 8, %v2201_v34  ;;  %v2210_v46 = vadd.s32 16, %v2201_v34  ;;  %v2216_v49 = vadd.s32 32, %v2201_v34 }
 0x127   : > { %v2185_v0 = vsub.f32 %v847_v50, %v685_v61  ;;  %v2219_v50 = vadd.s32 56, %v2201_v34  ;;  %v2228_v58 = vadd.s32 64, %v2201_v34  ;;  %v2231_v61 = vadd.s32 88, %v2201_v34 }
 0x128   : > { %v929_v3 = vmin.f32 %v925_v45, %v2183_v59  ;;  %v2207_v45 = vadd.s32 24, %v2201_v34  ;;  %v2273_v28 = vadd.s32 200, %v2201_v34 }
 0x129   : > { %v928_v4 = vmin.f32 %v924_v48, %v2185_v0  ;;  %v1709_v6 = vpop.f32.mrb[28].mxu0  ;;  %v2213_v48 = vadd.s32 40, %v2201_v34  ;;  %2628 = vst [vmem:[#allocation3_spill] sm:$0xff] %v2231_v61 }
 0x12a   : > { %v2189_v7 = vsub.f32 %v862_v63, %v1709_v6  ;;  %v695_v8 = vpop.f32.mrb[29].mxu0  ;;  %v2234_v63 = vadd.s32 80, %v2201_v34  ;;  %v2243_v6 = vadd.s32 120, %v2201_v34  ;;  %2636 = vst [vmem:[#allocation11_spill] sm:$0xff] %v2273_v28  ;;  %v2296_v28 = vadd.s32 240, %v2201_v34 }
 0x12b   : > { %v2191_v9 = vsub.f32 %v857_v1, %v695_v8  ;;  %v2237_v1 = vadd.s32 104, %v2201_v34  ;;  %v2246_v8 = vadd.s32 112, %v2201_v34 }
 0x12c   : > { %v931_v10 = vmin.f32 %v927_v56, %v2189_v7  ;;  %v2222_v56 = vadd.s32 48, %v2201_v34  ;;  %2629 = vst [vmem:[#allocation4_spill] sm:$0xff] %v2234_v63  ;;  %2632 = vst [vmem:[#allocation7_spill] sm:$0xff] %v2243_v6 }
 0x12d   : > { %v930_v14 = vmin.f32 %v926_v57, %v2191_v9  ;;  %v1712_v15 = vpop.f32.mrb[30].mxu0  ;;  %v2225_v57 = vadd.s32 72, %v2201_v34  ;;  %2630 = vst [vmem:[#allocation5_spill] sm:$0xff] %v2237_v1  ;;  %2633 = vst [vmem:[#allocation8_spill] sm:$0xff] %v2246_v8 }
 0x12e   : > { %v2195_v17 = vsub.f32 %v872_v12, %v1712_v15  ;;  %v705_v18 = vpop.f32.mrb[31].mxu0  ;;  %v2252_v12 = vadd.s32 128, %v2201_v34  ;;  %v2258_v15 = vadd.s32 144, %v2201_v34  ;;  %2642 = vst [vmem:[#allocation17_spill] sm:$0xff] %v2296_v28 }
 0x12f   : > { %v934_v20 = vmin.f32 %v930_v14, %v931_v10  ;;  %v2197_v22 = vsub.f32 %v867_v16, %v705_v18  ;;  %v2249_v10 = vadd.s32 136, %v2201_v34  ;;  %v2255_v14 = vadd.s32 152, %v2201_v34 }
 0x130   : > { %2627 = vst [vmem:[#allocation2_spill] sm:$0xff] %v2195_v17  ;;  %v933_v23 = vmin.f32 %v929_v3, %v2195_v17  ;;  %v2240_v3 = vadd.s32 96, %v2201_v34  ;;  %v2261_v16 = vadd.s32 168, %v2201_v34 }
 0x131   : > { %v932_v24 = vmin.f32 %v928_v4, %v2197_v22 }
 0x132   : > { %2631 = vst [vmem:[#allocation6_spill] sm:$0xff] %v2240_v3 }
 0x133   : > { %v935_v31 = vmin.f32 %v932_v24, %v933_v23  ;;  %v2267_v23 = vadd.s32 184, %v2201_v34  ;;  %v2270_v24 = vadd.s32 176, %v2201_v34 }
 0x135   : > { %v936_v33 = vmin.f32 %v934_v20, %v935_v31  ;;  %v2264_v20 = vadd.s32 160, %v2201_v34  ;;  %2634 = vst [vmem:[#allocation9_spill] sm:$0xff] %v2267_v23  ;;  %2635 = vst [vmem:[#allocation10_spill] sm:$0xff] %v2270_v24  ;;  %v2276_v31 = vadd.s32 192, %v2201_v34  ;;  %v2290_v23 = vadd.s32 224, %v2201_v34 }
 0x136   : > { %v2293_v24 = vadd.s32 248, %v2201_v34 }
 0x137   : > { %v937_v35 = vrot.slane %v936_v33, 4  ;;  %2640 = vst [vmem:[#allocation15_spill] sm:$0xff] %v2290_v23 }
 0x138   : > { %2641 = vst [vmem:[#allocation16_spill] sm:$0xff] %v2293_v24 }
 0x139   : > { %v938_v38 = vmin.f32 %v936_v33, %v937_v35  ;;  %v2279_v33 = vadd.s32 216, %v2201_v34  ;;  %v2282_v35 = vadd.s32 208, %v2201_v34 }
 0x13b   : > { %v939_v53 = vrot.slane %v938_v38, 2  ;;  %2637 = vst [vmem:[#allocation12_spill] sm:$0xff] %v2279_v33  ;;  %2638 = vst [vmem:[#allocation13_spill] sm:$0xff] %v2282_v35 }
 0x13d   : > { %v940_v4 = vmin.f32 %v938_v38, %v939_v53  ;;  %v2287_v53 = vadd.s32 232, %v2201_v34 }
 0x13f   : > { %v941_v18 = vrot.slane %v940_v4, 1  ;;  %2639 = vst [vmem:[#allocation14_spill] sm:$0xff] %v2287_v53 }
 0x141   : > { %v2284_v38 = vmin.f32 %v940_v4, %v941_v18 }
 0x143   : > { %vm976_vm1 = vcmp.eq.f32.partialorder %v2106_v29, %v2284_v38  ;;  %vm977_vm2 = vcmp.eq.f32.partialorder %v2102_v26, %v2284_v38  ;;  %vm978_vm3 = vcmp.eq.f32.partialorder %v2118_v39, %v2284_v38  ;;  %vm979_vm4 = vcmp.eq.f32.partialorder %v2114_v36, %v2284_v38 }
 0x144   : > { %vm980_vm5 = vcmp.eq.f32.partialorder %v2108_v30, %v2284_v38  ;;  %vm981_vm6 = vcmp.eq.f32.partialorder %v2104_v27, %v2284_v38  ;;  %vm982_vm7 = vcmp.eq.f32.partialorder %v2120_v40, %v2284_v38  ;;  %vm983_vm8 = vcmp.eq.f32.partialorder %v2116_v37, %v2284_v38 }
 0x145   : > { %vm984_vm9 = vcmp.eq.f32.partialorder %v2128_v47, %v2284_v38  ;;  %vm1001_vm12 = vcmp.eq.f32.partialorder %v2177_v51, %v2284_v38  ;;  %vm1002_vm13 = vcmp.eq.f32.partialorder %v2185_v0, %v2284_v38  ;;  %vm1003_vm14 = vcmp.eq.f32.partialorder %v2183_v59, %v2284_v38 }
 0x146   : > { %vm1004_vm15 = vcmp.eq.f32.partialorder %v2191_v9, %v2284_v38  ;;  %vm1005_vm0 = vcmp.eq.f32.partialorder %v2189_v7, %v2284_v38  ;;  %vm1006_vm10 = vcmp.eq.f32.partialorder %v2197_v22, %v2284_v38  ;;  %vm1007_vm11 = vcmp.eq.f32.partialorder %v2195_v17, %v2284_v38 }
 0x147   : > { %v1008_v4 = vsel %vm976_vm1, %v2201_v34, 256  ;;  %v1009_v18 = vsel %vm977_vm2, %v2204_v42, 256  ;;  %v1010_v24 = vsel %vm978_vm3, %v2210_v46, 256  ;;  %v1011_v17 = vsel %vm979_vm4, %v2207_v45, 256 }
 0x148   : > { %v1012_v29 = vsel %vm980_vm5, %v2216_v49, 256  ;;  %v1013_v26 = vsel %vm981_vm6, %v2213_v48, 256  ;;  %v1014_v39 = vsel %vm982_vm7, %v2222_v56, 256  ;;  %v1015_v36 = vsel %vm983_vm8, %v2219_v50, 256 }
 0x149   : > { %v1016_v30 = vsel %vm984_vm9, %v2228_v58, 256  ;;  %vm2643_vm1 = vcmp.eq.f32.partialorder %v2126_v44, %v2284_v38  ;;  %vm2644_vm2 = vcmp.eq.f32.partialorder %v2134_v54, %v2284_v38  ;;  %vm2645_vm3 = vcmp.eq.f32.partialorder %v2132_v52, %v2284_v38 }
 0x14a   : > { %v1017_v27 = vsel %vm2643_vm1, %v2225_v57, 256  ;;  %v1018_v40 = vsel %vm2644_vm2, %v2234_v63, 256  ;;  %v1019_v37 = vsel %vm2645_vm3, %v2231_v61, 256  ;;  %vm2646_vm4 = vcmp.eq.f32.partialorder %v2140_v62, %v2284_v38 }
 0x14b   : > { %v1020_v47 = vsel %vm2646_vm4, %v2240_v3, 256  ;;  %vm2647_vm5 = vcmp.eq.f32.partialorder %v2138_v60, %v2284_v38  ;;  %vm2648_vm6 = vcmp.eq.f32.partialorder %v2146_v5, %v2284_v38  ;;  %vm2649_vm7 = vcmp.eq.f32.partialorder %v2144_v2, %v2284_v38  ;;  %v2662_v3 = vld [vmem:[#allocation16_spill] sm:$0xff] }
 0x14c   : > { %v1021_v44 = vsel %vm2647_vm5, %v2237_v1, 256  ;;  %v1022_v54 = vsel %vm2648_vm6, %v2246_v8, 256  ;;  %v1023_v52 = vsel %vm2649_vm7, %v2243_v6, 256  ;;  %vm2650_vm8 = vcmp.eq.f32.partialorder %v2155_v13, %v2284_v38  ;;  %v2656_v6 = vld [vmem:[#allocation10_spill] sm:$0xff]  ;;  %v2658_v8 = vld [vmem:[#allocation9_spill] sm:$0xff]  ;;  %v2661_v1 = vld [vmem:[#allocation11_spill] sm:$0xff] }
 0x14d   : > { %v1024_v62 = vsel %vm2650_vm8, %v2252_v12, 256  ;;  %vm2651_vm9 = vcmp.eq.f32.partialorder %v2153_v11, %v2284_v38  ;;  %vm2652_vm1 = vcmp.eq.f32.partialorder %v2161_v21, %v2284_v38  ;;  %vm2653_vm2 = vcmp.eq.f32.partialorder %v2159_v19, %v2284_v38 }
 0x14e   : > { %v1025_v60 = vsel %vm2651_vm9, %v2249_v10, 256  ;;  %v1026_v5 = vsel %vm2652_vm1, %v2258_v15, 256  ;;  %v1027_v2 = vsel %vm2653_vm2, %v2255_v14, 256  ;;  %vm2654_vm3 = vcmp.eq.f32.partialorder %v2167_v32, %v2284_v38 }
 0x14f   : > { %v1028_v13 = vsel %vm2654_vm3, %v2264_v20, 256  ;;  %vm2655_vm4 = vcmp.eq.f32.partialorder %v2165_v25, %v2284_v38  ;;  %vm2657_vm5 = vcmp.eq.f32.partialorder %v2173_v43, %v2284_v38  ;;  %vm2659_vm6 = vcmp.eq.f32.partialorder %v2171_v41, %v2284_v38 }
 0x150   : > { %v1029_v11 = vsel %vm2655_vm4, %v2261_v16, 256  ;;  %v1030_v21 = vsel %vm2657_vm5, %v2656_v6, 256  ;;  %v1031_v19 = vsel %vm2659_vm6, %v2658_v8, 256  ;;  %vm2660_vm7 = vcmp.eq.f32.partialorder %v2179_v55, %v2284_v38 }
 0x151   : > { %v1032_v32 = vsel %vm2660_vm7, %v2276_v31, 256  ;;  %v1033_v25 = vsel %vm1001_vm12, %v2661_v1, 256  ;;  %v1034_v43 = vsel %vm1002_vm13, %v2282_v35, 256  ;;  %v1035_v41 = vsel %vm1003_vm14, %v2279_v33, 256 }
 0x152   : > { %v1036_v55 = vsel %vm1004_vm15, %v2290_v23, 256  ;;  %v1037_v51 = vsel %vm1005_vm0, %v2287_v53, 256  ;;  %v1038_v0 = vsel %vm1006_vm10, %v2296_v28, 256  ;;  %v1039_v59 = vsel %vm1007_vm11, %v2662_v3, 256 }
 0x153   : > { %vm1040_vm12 = vcmp.lt.s32.totalorder %v1008_v4, %v1012_v29  ;;  %vm1042_vm13 = vcmp.lt.s32.totalorder %v1009_v18, %v1013_v26  ;;  %vm1044_vm14 = vcmp.lt.s32.totalorder %v1010_v24, %v1014_v39  ;;  %vm1046_vm8 = vcmp.lt.s32.totalorder %v1011_v17, %v1015_v36 }
 0x154   : > { %v1041_v9 = vsel %vm1040_vm12, %v1008_v4, %v1012_v29  ;;  %v1043_v23 = vsel %vm1042_vm13, %v1009_v18, %v1013_v26  ;;  %v1045_v63 = vsel %vm1044_vm14, %v1010_v24, %v1014_v39  ;;  %v1047_v33 = vsel %vm1046_vm8, %v1011_v17, %v1015_v36 }
 0x155   : > { %vm1048_vm15 = vcmp.lt.s32.totalorder %v1041_v9, %v1016_v30  ;;  %vm1050_vm0 = vcmp.lt.s32.totalorder %v1043_v23, %v1017_v27  ;;  %vm1052_vm9 = vcmp.lt.s32.totalorder %v1045_v63, %v1018_v40  ;;  %vm1054_vm1 = vcmp.lt.s32.totalorder %v1047_v33, %v1019_v37 }
 0x156   : > { %v1049_v7 = vsel %vm1048_vm15, %v1041_v9, %v1016_v30  ;;  %v1051_v22 = vsel %vm1050_vm0, %v1043_v23, %v1017_v27  ;;  %v1053_v28 = vsel %vm1052_vm9, %v1045_v63, %v1018_v40  ;;  %v1055_v53 = vsel %vm1054_vm1, %v1047_v33, %v1019_v37 }
 0x157   : > { %vm1056_vm10 = vcmp.lt.s32.totalorder %v1049_v7, %v1020_v47  ;;  %vm1058_vm2 = vcmp.lt.s32.totalorder %v1051_v22, %v1021_v44  ;;  %vm1060_vm3 = vcmp.lt.s32.totalorder %v1053_v28, %v1022_v54  ;;  %vm1062_vm11 = vcmp.lt.s32.totalorder %v1055_v53, %v1023_v52 }
 0x158   : > { %v1057_v61 = vsel %vm1056_vm10, %v1049_v7, %v1020_v47  ;;  %v1059_v38 = vsel %vm1058_vm2, %v1051_v22, %v1021_v44  ;;  %v1061_v3 = vsel %vm1060_vm3, %v1053_v28, %v1022_v54  ;;  %v1063_v35 = vsel %vm1062_vm11, %v1055_v53, %v1023_v52  ;;  %v1783_v22 = vld [vmem:[%s1879_s8 + $0x10] sm:$0xff] }
 0x159   : > { %vm1064_vm4 = vcmp.lt.s32.totalorder %v1057_v61, %v1024_v62  ;;  %vm1066_vm5 = vcmp.lt.s32.totalorder %v1059_v38, %v1025_v60  ;;  %vm1068_vm6 = vcmp.lt.s32.totalorder %v1061_v3, %v1026_v5  ;;  %vm1070_vm7 = vcmp.lt.s32.totalorder %v1063_v35, %v1027_v2 }
 0x15a   : > { %v1065_v17 = vsel %vm1064_vm4, %v1057_v61, %v1024_v62  ;;  %v1067_v24 = vsel %vm1066_vm5, %v1059_v38, %v1025_v60  ;;  %v1069_v4 = vsel %vm1068_vm6, %v1061_v3, %v1026_v5  ;;  %v1071_v18 = vsel %vm1070_vm7, %v1063_v35, %v1027_v2 }
 0x15b   : > { %vm1072_vm12 = vcmp.lt.s32.totalorder %v1065_v17, %v1028_v13  ;;  %vm1074_vm13 = vcmp.lt.s32.totalorder %v1067_v24, %v1029_v11  ;;  %vm1076_vm14 = vcmp.lt.s32.totalorder %v1069_v4, %v1030_v21  ;;  %vm1078_vm8 = vcmp.lt.s32.totalorder %v1071_v18, %v1031_v19 }
 0x15c   : > { %v1073_v63 = vsel %vm1072_vm12, %v1065_v17, %v1028_v13  ;;  %v1075_v23 = vsel %vm1074_vm13, %v1067_v24, %v1029_v11  ;;  %v1077_v33 = vsel %vm1076_vm14, %v1069_v4, %v1030_v21  ;;  %v1079_v29 = vsel %vm1078_vm8, %v1071_v18, %v1031_v19  ;;  %v1781_v19 = vld [vmem:[%s1879_s8] sm:$0xff] }
 0x15d   : > { %vm1080_vm15 = vcmp.lt.s32.totalorder %v1073_v63, %v1032_v32  ;;  %vm1082_vm0 = vcmp.lt.s32.totalorder %v1075_v23, %v1033_v25  ;;  %vm1084_vm9 = vcmp.lt.s32.totalorder %v1077_v33, %v1034_v43  ;;  %vm1086_vm1 = vcmp.lt.s32.totalorder %v1079_v29, %v1035_v41 }
 0x15e   : > { %v1081_v28 = vsel %vm1080_vm15, %v1073_v63, %v1032_v32  ;;  %v1083_v53 = vsel %vm1082_vm0, %v1075_v23, %v1033_v25  ;;  %v1085_v26 = vsel %vm1084_vm9, %v1077_v33, %v1034_v43  ;;  %v1087_v39 = vsel %vm1086_vm1, %v1079_v29, %v1035_v41  ;;  %v1782_v43 = vld [vmem:[%s1879_s8 + $0x8] sm:$0xff]  ;;  %v1784_v63 = vld [vmem:[%s1879_s8 + $0x18] sm:$0xff] }
 0x15f   : > { %vm1088_vm10 = vcmp.lt.s32.totalorder %v1081_v28, %v1036_v55  ;;  %vm1090_vm2 = vcmp.lt.s32.totalorder %v1083_v53, %v1037_v51  ;;  %vm1092_vm3 = vcmp.lt.s32.totalorder %v1085_v26, %v1038_v0  ;;  %vm1094_vm11 = vcmp.lt.s32.totalorder %v1087_v39, %v1039_v59 }
 0x160   : > { %v1089_v3 = vsel %vm1088_vm10, %v1081_v28, %v1036_v55  ;;  %v1091_v35 = vsel %vm1090_vm2, %v1083_v53, %v1037_v51  ;;  %v1093_v36 = vsel %vm1092_vm3, %v1085_v26, %v1038_v0  ;;  %v1095_v30 = vsel %vm1094_vm11, %v1087_v39, %v1039_v59 }
 0x161   : > { %vm1096_vm4 = vcmp.lt.s32.totalorder %v1089_v3, %v1091_v35  ;;  %vm1098_vm5 = vcmp.lt.s32.totalorder %v1093_v36, %v1095_v30  ;;  %v1810_v5 = vmov 1.0|1.0  }
 0x162   : > { %v1097_v27 = vsel %vm1096_vm4, %v1089_v3, %v1091_v35  ;;  %v1099_v40 = vsel %vm1098_vm5, %v1093_v36, %v1095_v30 }
 0x163   : > { %vm1100_vm6 = vcmp.lt.s32.totalorder %v1097_v27, %v1099_v40 }
 0x164   : > { %v1101_v37 = vsel %vm1100_vm6, %v1097_v27, %v1099_v40 }
 0x165   : > { %v1102_v47 = vrot.slane %v1101_v37, 4 }
 0x167   : > { %vm1103_vm7 = vcmp.lt.s32.totalorder %v1101_v37, %v1102_v47 }
 0x168   : > { %v1104_v44 = vsel %vm1103_vm7, %v1101_v37, %v1102_v47 }
 0x169   : > { %v1105_v54 = vrot.slane %v1104_v44, 2 }
 0x16b   : > { %vm1106_vm12 = vcmp.lt.s32.totalorder %v1104_v44, %v1105_v54 }
 0x16c   : > { %v1107_v52 = vsel %vm1106_vm12, %v1104_v44, %v1105_v54 }
 0x16d   : > { %v1108_v62 = vrot.slane %v1107_v52, 1 }
 0x16f   : > { %vm1109_vm13 = vcmp.lt.s32.totalorder %v1107_v52, %v1108_v62 }
 0x170   : > { %v2494_v60 = vsel %vm1109_vm13, %v1107_v52, %v1108_v62 }
 0x171   : > { %1300 = vst [vmem:[%s309_s11] sm:$0x1] %v2494_v60  ;;  %vm1127_vm14 = vcmp.eq.s32.totalorder %v2252_v12, %v2494_v60  ;;  %vm1128_vm8 = vcmp.eq.s32.totalorder %v2249_v10, %v2494_v60  ;;  %vm1111_vm15 = vcmp.eq.s32.totalorder %v2201_v34, %v2494_v60  ;;  %vm1112_vm0 = vcmp.eq.s32.totalorder %v2204_v42, %v2494_v60  ;;  %v2664_v34 = vld [vmem:[#allocation13_spill] sm:$0xff]  ;;  %v2665_v42 = vld [vmem:[#allocation12_spill] sm:$0xff] }
 0x172   : > { %vm1721_vm9 = vmpackc.low %vm1128_vm8, %vm1127_vm14  ;;  %vm1129_vm1 = vcmp.eq.s32.totalorder %v2258_v15, %v2494_v60  ;;  %vm1130_vm10 = vcmp.eq.s32.totalorder %v2255_v14, %v2494_v60  ;;  %vm1113_vm11 = vcmp.eq.s32.totalorder %v2210_v46, %v2494_v60  ;;  %vm1114_vm4 = vcmp.eq.s32.totalorder %v2207_v45, %v2494_v60  ;;  %v2666_v45 = vld [vmem:[#allocation4_spill] sm:$0xff]  ;;  %v2667_v46 = vld [vmem:[#allocation3_spill] sm:$0xff] }
 0x173   : > { %1722 = vmatprep.subr.msk.bf16.mxu1 %vm1721_vm9, %v1810_v5  ;;  %vm1723_vm2 = vmpackc.low %vm1112_vm0, %vm1111_vm15  ;;  %vm1131_vm5 = vcmp.eq.s32.totalorder %v2264_v20, %v2494_v60  ;;  %vm1132_vm6 = vcmp.eq.s32.totalorder %v2261_v16, %v2494_v60  ;;  %vm1115_vm13 = vcmp.eq.s32.totalorder %v2216_v49, %v2494_v60  ;;  %vm1116_vm14 = vcmp.eq.s32.totalorder %v2213_v48, %v2494_v60  ;;  %v2668_v48 = vld [vmem:[#allocation15_spill] sm:$0xff]  ;;  %v2669_v49 = vld [vmem:[#allocation14_spill] sm:$0xff] }
 0x174   : > { %1724 = vmatpush3.bf16.msk.msra.mxu1 %vm1723_vm2, %v1810_v5  ;;  %vm1725_vm3 = vmpackc.low %vm1130_vm10, %vm1129_vm1  ;;  %vm1133_vm8 = vcmp.eq.s32.totalorder %v2656_v6, %v2494_v60  ;;  %vm1134_vm15 = vcmp.eq.s32.totalorder %v2658_v8, %v2494_v60  ;;  %vm1117_vm1 = vcmp.eq.s32.totalorder %v2222_v56, %v2494_v60  ;;  %vm1118_vm10 = vcmp.eq.s32.totalorder %v2219_v50, %v2494_v60  ;;  %v2670_v50 = vld [vmem:[#allocation6_spill] sm:$0xff]  ;;  %v2671_v56 = vld [vmem:[#allocation5_spill] sm:$0xff] }
 0x175   : > { %1726 = vmatprep.subr.msk.bf16.mxu1 %vm1725_vm3, %v1810_v5  ;;  %vm1727_vm7 = vmpackc.low %vm1114_vm4, %vm1113_vm11  ;;  %vm1135_vm2 = vcmp.eq.s32.totalorder %v2276_v31, %v2494_v60  ;;  %vm1136_vm3 = vcmp.eq.s32.totalorder %v2661_v1, %v2494_v60  ;;  %v2674_v1 = vld [vmem:[#allocation8_spill] sm:$0xff]  ;;  %v2675_v6 = vld [vmem:[#allocation7_spill] sm:$0xff] }
 0x176   : > { %vm1729_vm12 = vmpackc.low %vm1132_vm6, %vm1131_vm5  ;;  %vm1119_vm5 = vcmp.eq.s32.totalorder %v2228_v58, %v2494_v60  ;;  %vm1120_vm6 = vcmp.eq.s32.totalorder %v2225_v57, %v2494_v60  ;;  %v2672_v57 = vld [vmem:[#allocation17_spill] sm:$0xff]  ;;  %v2673_v58 = vld [vmem:[#allocation16_spill] sm:$0xff] }
 0x177   : > { %vm1731_vm0 = vmpackc.low %vm1116_vm14, %vm1115_vm13  ;;  %v352_v8 = vld [vmem:[%s2606_s2] sm:$0xff]  ;;  %v355_v10 = vld [vmem:[%s2606_s2 + $0x18] sm:$0xff] }
 0x178   : > { %1728 = vmatpush3.bf16.msk.msra.mxu1 %vm1727_vm7, %v1810_v5  ;;  %vm1733_vm9 = vmpackc.low %vm1134_vm15, %vm1133_vm8  ;;  %vm1137_vm7 = vcmp.eq.s32.totalorder %v2664_v34, %v2494_v60  ;;  %vm1121_vm8 = vcmp.eq.s32.totalorder %v2666_v45, %v2494_v60  ;;  %vm1122_vm15 = vcmp.eq.s32.totalorder %v2667_v46, %v2494_v60  ;;  %v354_v12 = vld [vmem:[%s2606_s2 + $0x10] sm:$0xff]  ;;  %v357_v14 = vld [vmem:[%s2606_s2 + $0x28] sm:$0xff] }
 0x179   : > { %1730 = vmatprep.subr.msk.bf16.mxu1 %vm1729_vm12, %v1810_v5  ;;  %vm1735_vm11 = vmpackc.low %vm1118_vm10, %vm1117_vm1  ;;  %vm1138_vm12 = vcmp.eq.s32.totalorder %v2665_v42, %v2494_v60  ;;  %v356_v15 = vld [vmem:[%s2606_s2 + $0x20] sm:$0xff]  ;;  %v359_v16 = vld [vmem:[%s2606_s2 + $0x38] sm:$0xff] }
 0x17a   : > { %vm1737_vm4 = vmpackc.low %vm1136_vm3, %vm1135_vm2  ;;  %vm1123_vm2 = vcmp.eq.s32.totalorder %v2670_v50, %v2494_v60  ;;  %vm1124_vm3 = vcmp.eq.s32.totalorder %v2671_v56, %v2494_v60  ;;  %v358_v20 = vld [vmem:[%s2606_s2 + $0x30] sm:$0xff] }
 0x17b   : > { %vm1739_vm13 = vmpackc.low %vm1120_vm6, %vm1119_vm5 }
 0x17c   : > { %1732 = vmatpush3.bf16.msk.msra.mxu1 %vm1731_vm0, %v1810_v5  ;;  %vm1741_vm14 = vmpackc.low %vm1138_vm12, %vm1137_vm7  ;;  %vm1139_vm0 = vcmp.eq.s32.totalorder %v2668_v48, %v2494_v60  ;;  %vm1125_vm7 = vcmp.eq.s32.totalorder %v2674_v1, %v2494_v60  ;;  %vm1126_vm12 = vcmp.eq.s32.totalorder %v2675_v6, %v2494_v60 }
 0x17d   : > { %1734 = vmatprep.subr.msk.bf16.mxu1 %vm1733_vm9, %v1810_v5  ;;  %vm1140_vm9 = vcmp.eq.s32.totalorder %v2669_v49, %v2494_v60  ;;  %vm1743_vm1 = vmpackc.low %vm1122_vm15, %vm1121_vm8 }
 0x17e   : > { %vm1745_vm10 = vmpackc.low %vm1140_vm9, %vm1139_vm0 }
 0x17f   : > { %vm1747_vm5 = vmpackc.low %vm1124_vm3, %vm1123_vm2 }
 0x180   : > { %1736 = vmatpush3.bf16.msk.msra.mxu1 %vm1735_vm11, %v1810_v5  ;;  %vm1141_vm11 = vcmp.eq.s32.totalorder %v2672_v57, %v2494_v60 }
 0x181   : > { %1738 = vmatprep.subr.msk.bf16.mxu1 %vm1737_vm4, %v1810_v5  ;;  %vm1142_vm4 = vcmp.eq.s32.totalorder %v2673_v58, %v2494_v60 }
 0x182   : > { %vm1749_vm6 = vmpackc.low %vm1142_vm4, %vm1141_vm11 }
 0x184   : > { %1740 = vmatpush3.bf16.msk.msra.mxu1 %vm1739_vm13, %v1810_v5  ;;  %vm1751_vm13 = vmpackc.low %vm1126_vm12, %vm1125_vm7 }
 0x185   : > { %1742 = vmatprep.subr.msk.bf16.mxu1 %vm1741_vm14, %v1810_v5 }
 0x188   : > { %1744 = vmatpush3.bf16.msk.msra.mxu1 %vm1743_vm1, %v1810_v5 }
 0x189   : > { %1746 = vmatprep.subr.msk.bf16.mxu1 %vm1745_vm10, %v1810_v5 }
 0x18c   : > { %1748 = vmatpush3.bf16.msk.msra.mxu1 %vm1747_vm5, %v1810_v5 }
 0x18d   : > { %1750 = vmatprep.subr.msk.bf16.mxu1 %vm1749_vm6, %v1810_v5 }
 0x190   : > { %1752 = vmatpush3.bf16.msk.msra.mxu1 %vm1751_vm13, %v1810_v5 }
 0x193   : > { %1272 = vmatmul.mubr.f32.vlgmr.msra.gmra.mrb[0].mxu1 %v352_v8 }
 0x194   : > { %1276 = vmatprep.mubr.f32.mxu1 %v355_v10 }
 0x197   : > { %1277 = vmatmul.mubr.f32.gmra.mrb[2].mxu1 %v354_v12 }
 0x198   : > { %1281 = vmatprep.mubr.f32.mxu1 %v357_v14 }
 0x19b   : > { %1282 = vmatmul.mubr.f32.gmra.mrb[4].mxu1 %v356_v15 }
 0x19c   : > { %1286 = vmatprep.mubr.f32.mxu1 %v359_v16 }
 0x19f   : > { %1287 = vmatmul.mubr.f32.gmra.mrb[6].mxu1 %v358_v20 }
 0x266   : > { %v1645_v31 = vpop.f32.mrb[0].mxu1 }
 0x267   : > { %v1646_v2 = vpop.f32.mrb[1].mxu1 }
 0x268   : > { %v1647_v13 = vadd.f32 %v1646_v2, %v1645_v31 }
 0x26a   : > { %1296 = vst [vmem:[%s303_s10] sm:$0xff] %v1647_v13  ;;  %v1648_v11 = vpop.f32.mrb[2].mxu1  ;;  %v1292_v32 = vsub.f32 %v1647_v13, %v1781_v19 }
 0x26b   : > { %v1649_v21 = vpop.f32.mrb[3].mxu1 }
 0x26c   : > { %v1650_v25 = vadd.f32 %v1649_v21, %v1648_v11  ;;  %v1301_v0 = vmul.f32 %v1292_v32, %v1292_v32 }
 0x26e   : > { %v1293_v41 = vsub.f32 %v1650_v25, %v1782_v43  ;;  %1297 = vst [vmem:[%s303_s10 + $0x8] sm:$0xff] %v1650_v25  ;;  %v1651_v55 = vpop.f32.mrb[4].mxu1 }
 0x26f   : > { %v1652_v51 = vpop.f32.mrb[5].mxu1 }
 0x270   : > { %v1302_v59 = vmul.f32 %v1293_v41, %v1293_v41  ;;  %v1653_v9 = vadd.f32 %v1652_v51, %v1651_v55 }
 0x272   : > { %v1305_v7 = vadd.f32 %v1302_v59, %v1301_v0  ;;  %v1294_v61 = vsub.f32 %v1653_v9, %v1783_v22  ;;  %1298 = vst [vmem:[%s303_s10 + $0x10] sm:$0xff] %v1653_v9  ;;  %v1654_v38 = vpop.f32.mrb[6].mxu1 }
 0x273   : > { %v1655_v17 = vpop.f32.mrb[7].mxu1 }
 0x274   : > { %v1303_v24 = vmul.f32 %v1294_v61, %v1294_v61  ;;  %v1656_v4 = vadd.f32 %v1655_v17, %v1654_v38 }
 0x276   : > { %v1306_v18 = vadd.f32 %v1305_v7, %v1303_v24  ;;  %v1295_v23 = vsub.f32 %v1656_v4, %v1784_v63  ;;  %1299 = vst [vmem:[%s303_s10 + $0x18] sm:$0xff] %v1656_v4 }
 0x278   : > { %v1304_v33 = vmul.f32 %v1295_v23, %v1295_v23 }
 0x27a   : > { %v1307_v29 = vadd.f32 %v1306_v18, %v1304_v33 }
 0x27c   : > { %v1308_v28 = vrot.slane %v1307_v29, 4 }
 0x27e   : > { %v1309_v53 = vadd.f32 %v1308_v28, %v1307_v29 }
 0x280   : > { %v1310_v26 = vrot.slane %v1309_v53, 2 }
 0x282   : > { %v1311_v39 = vadd.f32 %v1310_v26, %v1309_v53 }
 0x284   : > { %v1312_v3 = vrot.slane %v1311_v39, 1 }
 0x286   : > { %v1313_v35 = vadd.f32 %v1312_v3, %v1311_v39 }
 0x288   : > { %1314 = vst [vmem:[%s315_s12] sm:$0x1] %v1313_v35 }
 0x289 PF: > { %s17_s23 = sadd.s32 1, %s1807_s23   ;;  %s2676_s21 = smov %s1803_s22 }
 0x28a   : > { %p14_p5 = scmp.ge.s32.totalorder %s17_s23, 4   ;;  %s2677_s22 = smov %s2679_s24 }
 0x28c   :  { %16 = sbr.rel (!%p14_p5) target bundleno = 2 (0x2), region = 90 }

</bundles_post_ra>
